<compile_context>
chip_gen: v6e
topology: v6e:2x2x1
jax: 0.10.0
libtpu: 0.0.40
codegen_flags: <defaults>
</compile_context>

<pallas_src>
import functools

import jax
import jax.numpy as jnp
from jax import lax
from jax.experimental import pallas as pl
from jax.experimental.pallas import tpu as pltpu


def _round_up(x, m):
    return ((x + m - 1) // m) * m


# ----------------------------------------------------------------------------
# Kernel 1: (collapsed depthwise*pointwise) matmul + BN partial statistics.
#   pT: (K, TM)   w: (C8, K)   psum/psq: (1, C8, 128) lane-grouped partials.
# ----------------------------------------------------------------------------
def stats_kernel(pT_ref, w_ref, psum_ref, psq_ref):
    y = jnp.dot(w_ref[...], pT_ref[...], preferred_element_type=jnp.float32)  # (C8, TM)
    c8, tm = y.shape
    # Lane-group partial reduction: static 128-lane slices of a vreg-resident
    # value are free vreg selects -> pure VPU adds, no per-tile XLU reduce and
    # no narrow masked stores.  Tail reduce over (grid_m, C8, 128) is done in XLA.
    ps = jnp.zeros((c8, 128), jnp.float32)
    pq = jnp.zeros((c8, 128), jnp.float32)
    for g in range(tm // 128):
        blk = y[:, g * 128:(g + 1) * 128]
        ps = ps + blk
        pq = pq + blk * blk
    psum_ref[0] = ps
    psq_ref[0] = pq


# ----------------------------------------------------------------------------
# Kernel 2: recompute matmul with scale pre-folded into the weight, add shift.
#   pT: (K, TM)   w_scaled: (C8, K)   shift: (C8, 1)   o: (C8, TM)
# ----------------------------------------------------------------------------
def apply_kernel(pT_ref, w_ref, shift_ref, o_ref):
    y = jnp.dot(w_ref[...], pT_ref[...], preferred_element_type=jnp.float32)
    o_ref[...] = y + shift_ref[...]


# ----------------------------------------------------------------------------
# Width-only dilated im2col, TRANSPOSED (depthwise kernel is (1, kw)).
#   x: (N, Cin, H, W) -> patchesT (Cin*kw, N*Hout*Wout), K order = (c, t).
# ----------------------------------------------------------------------------
def _im2col_freq_T(x, kw, stride, padding, dilation):
    n, c, h, w = x.shape
    hout = (h - 1) // stride + 1
    wout = (w + 2 * padding - dilation * (kw - 1) - 1) // stride + 1
    xp = jnp.pad(x, ((0, 0), (0, 0), (0, 0), (padding, padding)))
    xh = xp[:, :, ::stride, :]                                # (N, C, Hout, Wp)
    taps = []
    for t in range(kw):
        start = t * dilation
        taps.append(xh[:, :, :, start:start + stride * (wout - 1) + 1:stride])
    col = jnp.stack(taps, axis=-1)                            # (N, C, Hout, Wout, kw)
    colT = col.transpose(1, 4, 0, 2, 3)                       # (C, kw, N, Hout, Wout)
    return colT.reshape(c * kw, n * hout * wout), hout, wout


def _vmem_limit_bytes(k, tm_eff, c8, in_bytes):
    # Double-buffered per-step footprint of the bigger of the two passes.
    pass1 = 2 * (k * tm_eff * in_bytes) + 2 * (c8 * k * in_bytes) + 2 * 2 * (c8 * 128 * 4)
    pass2 = (2 * (k * tm_eff * in_bytes) + 2 * (c8 * k * in_bytes)
             + 2 * (c8 * 4) + 2 * (c8 * tm_eff * 4))
    need = max(pass1, pass2)
    return int(min(max(2 * need, 4 * 1024 * 1024), 32 * 1024 * 1024))


@functools.partial(
    jax.jit,
    static_argnames=("stride", "padding", "dilation", "eps", "tm", "use_bf16"))
def dil_conv_freq(x, dw_weight, pw_weight, gamma, beta, *, stride, padding,
                  dilation, eps=1e-5, tm=2048, use_bf16=True):
    """x: (N,Cin,H,W) f32; dw_weight: (Cin,1,1,kw); pw_weight: (Cout,Cin,1,1)."""
    n, c_in, h, w = x.shape
    c_out = pw_weight.shape[0]
    kw = dw_weight.shape[-1]
    k = c_in * kw

    # ReLU in f32, fused by XLA into the im2col materialization (commutes with
    # the gather and the bf16 cast); avoids bf16 VPU work on v5e.
    xr = jnp.maximum(x, 0.0)
    patches_t, hout, wout = _im2col_freq_T(xr, kw, stride, padding, dilation)  # (K, M)
    m = patches_t.shape[1]

    # Output channels on sublanes: pad only to a multiple of 8 (no 128x blowup).
    c8 = _round_up(c_out, 8)

    # Row tile along LANES: multiple of 128; keep grid_m >= 2 when M allows it
    # so the "parallel" axis can shard across v7x's two TensorCores.
    tm_req = max(_round_up(tm, 128), 128)
    tm_half = max(_round_up((m + 1) // 2, 128), 128)
    tm_eff = min(tm_req, tm_half)
    assert tm_eff % 128 == 0
    m_pad = _round_up(m, tm_eff)
    grid_m = m_pad // tm_eff

    mxu_dtype = jnp.bfloat16 if use_bf16 else jnp.float32
    in_bytes = 2 if use_bf16 else 4

    if m_pad != m:
        patches_t = jnp.pad(patches_t, ((0, 0), (0, m_pad - m)))   # zero rows
    patches_mxu = patches_t.astype(mxu_dtype)

    # Collapsed + transposed weight:  w_t[co, c*kw + t] = pw[co,c] * dw[c,t].
    dw = dw_weight[:, 0, 0, :].astype(jnp.float32)            # (Cin, kw)
    pw = pw_weight[:, :, 0, 0].astype(jnp.float32)            # (Cout, Cin)
    w_t = (pw[:, :, None] * dw[None, :, :]).reshape(c_out, k)  # (Cout, K)
    w_t = jnp.pad(w_t, ((0, c8 - c_out), (0, 0)))               # (C8, K), K unpadded
    w_mxu = w_t.astype(mxu_dtype)

    vmem_limit = _vmem_limit_bytes(k, tm_eff, c8, in_bytes)

    # --- Pass 1: matmul + BN partial stats (no y written to HBM) -------------
    psum, psq = pl.pallas_call(
        stats_kernel,
        out_shape=(jax.ShapeDtypeStruct((grid_m, c8, 128), jnp.float32),
                   jax.ShapeDtypeStruct((grid_m, c8, 128), jnp.float32)),
        grid_spec=pltpu.PrefetchScalarGridSpec(
            num_scalar_prefetch=0,
            grid=(grid_m,),
            in_specs=[
                pl.BlockSpec((k, tm_eff), lambda i: (0, i)),
                pl.BlockSpec((c8, k), lambda i: (0, 0)),
            ],
            out_specs=[
                pl.BlockSpec((1, c8, 128), lambda i: (i, 0, 0)),
                pl.BlockSpec((1, c8, 128), lambda i: (i, 0, 0)),
            ]),
        compiler_params=pltpu.CompilerParams(
            dimension_semantics=("parallel",),
            vmem_limit_bytes=vmem_limit),
    )(patches_mxu, w_mxu)

    # Padded rows/channels are exact zeros -> contribute nothing; divide by true m.
    ysum = jnp.sum(psum, axis=(0, 2))
    ysq = jnp.sum(psq, axis=(0, 2))
    mean = ysum / m
    var = jnp.maximum(ysq / m - mean * mean, 0.0)   # biased var (PyTorch BN normalization)
    gamma_p = jnp.pad(gamma.astype(jnp.float32), (0, c8 - c_out), constant_values=1.0)
    beta_p = jnp.pad(beta.astype(jnp.float32), (0, c8 - c_out))
    scale = gamma_p / jnp.sqrt(var + eps)                     # (C8,)
    shift = (beta_p - mean * scale).reshape(c8, 1).astype(jnp.float32)
    # Fold scale into the weight once (XLA, (C8,K) array) -> one fewer VPU mul
    # and one fewer input stream in the apply pass.
    w_scaled = (w_t * scale[:, None]).astype(mxu_dtype)

    # --- Pass 2: recompute matmul (scale folded) + shift ---------------------
    out_cm = pl.pallas_call(
        apply_kernel,
        out_shape=jax.ShapeDtypeStruct((c8, m_pad), jnp.float32),
        grid_spec=pltpu.PrefetchScalarGridSpec(
            num_scalar_prefetch=0,
            grid=(grid_m,),
            in_specs=[
                pl.BlockSpec((k, tm_eff), lambda i: (0, i)),
                pl.BlockSpec((c8, k), lambda i: (0, 0)),
                pl.BlockSpec((c8, 1), lambda i: (0, 0)),
            ],
            out_specs=pl.BlockSpec((c8, tm_eff), lambda i: (0, i))),
        compiler_params=pltpu.CompilerParams(
            dimension_semantics=("parallel",),
            vmem_limit_bytes=vmem_limit),
    )(patches_mxu, w_scaled, shift)

    # Channel-major (C8, M) -> slice real channels/rows -> NCHW.  Only a tiny
    # leading-axes transpose of the UNPADDED result remains (no HWC relayout).
    out = out_cm[:c_out, :m].reshape(c_out, n, hout, wout)
    return jnp.transpose(out, (1, 0, 2, 3))


# ----------------------------------------------------------------------------
# Pure-JAX reference (correctness check for the Pallas path).
# ----------------------------------------------------------------------------
def dil_conv_freq_ref(x, dw_weight, pw_weight, gamma, beta, *, stride, padding,
                      dilation, eps=1e-5):
    c_in = x.shape[1]
    xr = jnp.maximum(x, 0.0)
    y = lax.conv_general_dilated(
        xr, dw_weight, window_strides=(stride, stride),
        padding=[(0, 0), (padding, padding)],
        rhs_dilation=(1, dilation),
        dimension_numbers=("NCHW", "OIHW", "NCHW"),
        feature_group_count=c_in)
    y = lax.conv_general_dilated(
        y, pw_weight, window_strides=(1, 1), padding=[(0, 0), (0, 0)],
        dimension_numbers=("NCHW", "OIHW", "NCHW"))
    mean = jnp.mean(y, axis=(0, 2, 3), keepdims=True)
    var = jnp.mean((y - mean) ** 2, axis=(0, 2, 3), keepdims=True)
    yhat = (y - mean) / jnp.sqrt(var + eps)
    return yhat * gamma[None, :, None, None] + beta[None, :, None, None]


if __name__ == "__main__":
    # Module config: DilConvFreq(c_in=4, c_out=8, kernel_size=3, stride=1,
    #                            padding=2, dilation=2, affine=True)
    N, C_IN, H, W = 2, 4, 16, 16
    C_OUT, KS, STRIDE, PAD, DIL = 8, 3, 1, 2, 2

    key = jax.random.PRNGKey(0)
    kx, k1, k2 = jax.random.split(key, 3)
    x = jax.random.normal(kx, (N, C_IN, H, W), dtype=jnp.float32)
    # PyTorch layouts: depthwise (Cin, 1, 1, kw), pointwise (Cout, Cin, 1, 1);
    # BN affine params follow PyTorch defaults (gamma=1, beta=0).
    dw_w = jax.random.normal(k1, (C_IN, 1, 1, KS), dtype=jnp.float32) * 0.3
    pw_w = jax.random.normal(k2, (C_OUT, C_IN, 1, 1), dtype=jnp.float32) * 0.3
    gamma = jnp.ones((C_OUT,), dtype=jnp.float32)
    beta = jnp.zeros((C_OUT,), dtype=jnp.float32)

    ref = dil_conv_freq_ref(x, dw_w, pw_w, gamma, beta,
                            stride=STRIDE, padding=PAD, dilation=DIL)

    # 1) f32 MXU path (multi-tile grid: M=512 -> grid_m=2), tight tolerance.
    out_f32 = dil_conv_freq(x, dw_w, pw_w, gamma, beta, stride=STRIDE,
                            padding=PAD, dilation=DIL, use_bf16=False)
    out_f32 = jax.block_until_ready(out_f32)
    assert out_f32.shape == ref.shape == (N, C_OUT, H, W)
    assert jnp.allclose(out_f32, ref, atol=1e-4, rtol=1e-4), "f32 mismatch vs reference"

    # 2) bf16 MXU path (default; f32 accumulation), looser tolerance.
    out_bf16 = dil_conv_freq(x, dw_w, pw_w, gamma, beta, stride=STRIDE,
                             padding=PAD, dilation=DIL, use_bf16=True)
    out_bf16 = jax.block_until_ready(out_bf16)
    assert jnp.allclose(out_bf16, ref, atol=1e-1, rtol=1e-1), "bf16 mismatch vs reference"

    # 3) strided config: exercises the strided/dilated im2col (single-tile grid).
    out_s2 = dil_conv_freq(x, dw_w, pw_w, gamma, beta, stride=2, padding=PAD,
                           dilation=DIL, use_bf16=False)
    out_s2 = jax.block_until_ready(out_s2)
    ref_s2 = dil_conv_freq_ref(x, dw_w, pw_w, gamma, beta, stride=2,
                               padding=PAD, dilation=DIL)
    assert out_s2.shape == ref_s2.shape == (N, C_OUT, 8, 8)
    assert jnp.allclose(out_s2, ref_s2, atol=1e-4, rtol=1e-4), "stride-2 mismatch vs reference"

    # 4) odd spatial size (M=450, not a multiple of 128): exercises zero-padded
    #    lane tail in the stats and output slicing.
    x_odd = x[:, :, :15, :15]
    out_odd = dil_conv_freq(x_odd, dw_w, pw_w, gamma, beta, stride=STRIDE,
                            padding=PAD, dilation=DIL, use_bf16=False)
    out_odd = jax.block_until_ready(out_odd)
    ref_odd = dil_conv_freq_ref(x_odd, dw_w, pw_w, gamma, beta, stride=STRIDE,
                                padding=PAD, dilation=DIL)
    assert out_odd.shape == ref_odd.shape == (N, C_OUT, 15, 15)
    assert jnp.allclose(out_odd, ref_odd, atol=1e-4, rtol=1e-4), "odd-size mismatch vs reference"

    print("KERNEL_OK")
</pallas_src>

<mosaic_0001>
module attributes {stable_mosaic.version = 11 : i64} {
  func.func @stats_kernel(%arg0: i32, %arg1: memref<12x256xf32, #tpu.memory_space<vmem>>, %arg2: memref<8x12xf32, #tpu.memory_space<vmem>>, %arg3: memref<1x8x128xf32, #tpu.memory_space<vmem>>, %arg4: memref<1x8x128xf32, #tpu.memory_space<vmem>>) attributes {dimension_semantics = [#tpu.dimension_semantics<parallel>], iteration_bounds = array<i64: 2>, scalar_prefetch = 0 : i64, scratch_operands = 0 : i64, tpu.core_type = #tpu.core_type<tc>, window_params = [{transform_indices = @transform_0, window_bounds = array<i64: 12, 256>}, {pipeline_mode = #tpu.pipeline_mode<synchronous>, transform_indices = @transform_1, window_bounds = array<i64: 8, 12>}, {transform_indices = @transform_2, window_bounds = array<i64: 1, 8, 128>}, {transform_indices = @transform_3, window_bounds = array<i64: 1, 8, 128>}]} {
    %c0 = arith.constant 0 : index
    %c0_0 = arith.constant 0 : index
    %0 = vector.load %arg2[%c0, %c0_0] : memref<8x12xf32, #tpu.memory_space<vmem>>, vector<8x12xf32>
    %c0_1 = arith.constant 0 : index
    %c0_2 = arith.constant 0 : index
    %1 = vector.load %arg1[%c0_1, %c0_2] : memref<12x256xf32, #tpu.memory_space<vmem>>, vector<12x256xf32>
    %cst = arith.constant dense<0.000000e+00> : vector<8x256xf32>
    %2 = tpu.matmul %0, %1, %cst {dimension_numbers = #tpu.dot_dimension_numbers<[1], [0], [0], [1], [0, 0, 1, 1], [], []>} : vector<8x12xf32>, vector<12x256xf32>, vector<8x256xf32> -> vector<8x256xf32>
    %cst_3 = arith.constant 0.000000e+00 : f32
    %3 = vector.broadcast %cst_3 : f32 to vector<8x128xf32>
    %cst_4 = arith.constant 0.000000e+00 : f32
    %4 = vector.broadcast %cst_4 : f32 to vector<8x128xf32>
    %5 = vector.extract_strided_slice %2 {offsets = [0, 0], sizes = [8, 128], strides = [1, 1]} : vector<8x256xf32> to vector<8x128xf32>
    %6 = arith.addf %3, %5 : vector<8x128xf32>
    %7 = arith.mulf %5, %5 : vector<8x128xf32>
    %8 = arith.addf %4, %7 : vector<8x128xf32>
    %9 = vector.extract_strided_slice %2 {offsets = [0, 128], sizes = [8, 128], strides = [1, 1]} : vector<8x256xf32> to vector<8x128xf32>
    %10 = arith.addf %6, %9 : vector<8x128xf32>
    %11 = arith.mulf %9, %9 : vector<8x128xf32>
    %12 = arith.addf %8, %11 : vector<8x128xf32>
    %c0_5 = arith.constant 0 : index
    %c0_6 = arith.constant 0 : index
    %c0_7 = arith.constant 0 : index
    %13 = vector.load %arg3[%c0_5, %c0_6, %c0_7] : memref<1x8x128xf32, #tpu.memory_space<vmem>>, vector<1x8x128xf32>
    %14 = vector.shape_cast %13 : vector<1x8x128xf32> to vector<8x128xf32>
    %15 = vector.shape_cast %10 : vector<8x128xf32> to vector<1x8x128xf32>
    tpu.vector_store %arg3[%c0_5, %c0_6, %c0_7], %15 {strides = array<i32>} : memref<1x8x128xf32, #tpu.memory_space<vmem>>, vector<1x8x128xf32>,
    %c0_8 = arith.constant 0 : index
    %c0_9 = arith.constant 0 : index
    %c0_10 = arith.constant 0 : index
    %16 = vector.load %arg4[%c0_8, %c0_9, %c0_10] : memref<1x8x128xf32, #tpu.memory_space<vmem>>, vector<1x8x128xf32>
    %17 = vector.shape_cast %16 : vector<1x8x128xf32> to vector<8x128xf32>
    %18 = vector.shape_cast %12 : vector<8x128xf32> to vector<1x8x128xf32>
    tpu.vector_store %arg4[%c0_8, %c0_9, %c0_10], %18 {strides = array<i32>} : memref<1x8x128xf32, #tpu.memory_space<vmem>>, vector<1x8x128xf32>,
    return
  }
  func.func @transform_0(%arg0: i32) -> (i32, i32) {
    %c0_i32 = arith.constant 0 : i32
    %c0_i32_0 = arith.constant 0 : i32
    return %c0_i32, %arg0 : i32, i32
  }
  func.func @transform_1(%arg0: i32) -> (i32, i32) {
    %c0_i32 = arith.constant 0 : i32
    %c0_i32_0 = arith.constant 0 : i32
    %c0_i32_1 = arith.constant 0 : i32
    return %c0_i32, %c0_i32_0 : i32, i32
  }
  func.func @transform_2(%arg0: i32) -> (i32, i32, i32) {
    %c0_i32 = arith.constant 0 : i32
    %c0_i32_0 = arith.constant 0 : i32
    %c0_i32_1 = arith.constant 0 : i32
    return %arg0, %c0_i32, %c0_i32_0 : i32, i32, i32
  }
  func.func @transform_3(%arg0: i32) -> (i32, i32, i32) {
    %c0_i32 = arith.constant 0 : i32
    %c0_i32_0 = arith.constant 0 : i32
    %c0_i32_1 = arith.constant 0 : i32
    return %arg0, %c0_i32, %c0_i32_0 : i32, i32, i32
  }
}

module attributes {stable_mosaic.version = 11 : i64} {
  func.func @apply_kernel(%arg0: i32, %arg1: memref<12x256xf32, #tpu.memory_space<vmem>>, %arg2: memref<8x12xf32, #tpu.memory_space<vmem>>, %arg3: memref<8x1xf32, #tpu.memory_space<vmem>>, %arg4: memref<8x256xf32, #tpu.memory_space<vmem>>) attributes {dimension_semantics = [#tpu.dimension_semantics<parallel>], iteration_bounds = array<i64: 2>, scalar_prefetch = 0 : i64, scratch_operands = 0 : i64, tpu.core_type = #tpu.core_type<tc>, window_params = [{transform_indices = @transform_0, window_bounds = array<i64: 12, 256>}, {pipeline_mode = #tpu.pipeline_mode<synchronous>, transform_indices = @transform_1, window_bounds = array<i64: 8, 12>}, {pipeline_mode = #tpu.pipeline_mode<synchronous>, transform_indices = @transform_2, window_bounds = array<i64: 8, 1>}, {transform_indices = @transform_3, window_bounds = array<i64: 8, 256>}]} {
    %c0 = arith.constant 0 : index
    %c0_0 = arith.constant 0 : index
    %0 = vector.load %arg2[%c0, %c0_0] : memref<8x12xf32, #tpu.memory_space<vmem>>, vector<8x12xf32>
    %c0_1 = arith.constant 0 : index
    %c0_2 = arith.constant 0 : index
    %1 = vector.load %arg1[%c0_1, %c0_2] : memref<12x256xf32, #tpu.memory_space<vmem>>, vector<12x256xf32>
    %cst = arith.constant dense<0.000000e+00> : vector<8x256xf32>
    %2 = tpu.matmul %0, %1, %cst {dimension_numbers = #tpu.dot_dimension_numbers<[1], [0], [0], [1], [0, 0, 1, 1], [], []>} : vector<8x12xf32>, vector<12x256xf32>, vector<8x256xf32> -> vector<8x256xf32>
    %c0_3 = arith.constant 0 : index
    %c0_4 = arith.constant 0 : index
    %3 = vector.load %arg3[%c0_3, %c0_4] : memref<8x1xf32, #tpu.memory_space<vmem>>, vector<8x1xf32>
    %4 = vector.broadcast %3 : vector<8x1xf32> to vector<8x256xf32>
    %5 = arith.addf %2, %4 : vector<8x256xf32>
    %c0_5 = arith.constant 0 : index
    %c0_6 = arith.constant 0 : index
    %6 = vector.load %arg4[%c0_5, %c0_6] : memref<8x256xf32, #tpu.memory_space<vmem>>, vector<8x256xf32>
    tpu.vector_store %arg4[%c0_5, %c0_6], %5 {strides = array<i32>} : memref<8x256xf32, #tpu.memory_space<vmem>>, vector<8x256xf32>,
    return
  }
  func.func @transform_0(%arg0: i32) -> (i32, i32) {
    %c0_i32 = arith.constant 0 : i32
    %c0_i32_0 = arith.constant 0 : i32
    return %c0_i32, %arg0 : i32, i32
  }
  func.func @transform_1(%arg0: i32) -> (i32, i32) {
    %c0_i32 = arith.constant 0 : i32
    %c0_i32_0 = arith.constant 0 : i32
    %c0_i32_1 = arith.constant 0 : i32
    return %c0_i32, %c0_i32_0 : i32, i32
  }
  func.func @transform_2(%arg0: i32) -> (i32, i32) {
    %c0_i32 = arith.constant 0 : i32
    %c0_i32_0 = arith.constant 0 : i32
    %c0_i32_1 = arith.constant 0 : i32
    return %c0_i32, %c0_i32_0 : i32, i32
  }
  func.func @transform_3(%arg0: i32) -> (i32, i32) {
    %c0_i32 = arith.constant 0 : i32
    %c0_i32_0 = arith.constant 0 : i32
    return %c0_i32, %arg0 : i32, i32
  }
}

</mosaic_0001>

<bundles_post_ra>
// kernel: dil_conv_freq.2
= control target key start
LH: loop header
LB: loop body
LE: loop exit
PB: predicated region body
PF: predicated region fallthrough
CT: control target
= control target key end

     0   :  { %s479_s12 = smov 0   ;;  %s481_s13 = smov 0   ;;  %s539_s0 = inlined_call_operand.vmem [shape: f32[12,512], index: 0, kind: input, shape index: {}]   ;;  %s540_s1 = inlined_call_operand.vmem [shape: f32[8,12], index: 1, kind: input, shape index: {}]   ;;  %s541_s2 = inlined_call_operand.vmem [shape: f32[2,8,128], index: 2, kind: output, shape index: {0}]   ;;  %s542_s3 = inlined_call_operand.vmem [shape: f32[2,8,128], index: 3, kind: output, shape index: {1}]  }
   0x1   :  { %s483_s14 = smov 0  }
   0x2 LB: > { %s392_s15 = sadd.s32 4294967295, %s456_s14   ;;  %s496_s16 = sadd.s32 1, %s456_s14   ;;  %s456_s14 = sphi %s483_s14, %s545_s14   ;;  %s452_s13 = sphi %s481_s13, %s544_s13   ;;  %s448_s12 = sphi %s479_s12, %s543_s12  }
   0x3   : > { %s18_s17 = ssub.s32 %s456_s14, %s496_s16  ;;  %s21_s18 = sadd.s32 1, %s452_s13 }
   0x4   : > { %p19_p0 = scmp.eq.s32.totalorder %s18_s17, 0  ;;  %p28_p1 = scmp.ne.s32.totalorder %s452_s13, %s448_s12 }
   0x5   : > { %p29_p2 = scmp.eq.s32.totalorder %s456_s14, 0  ;;  %p395_p4 = scmp.ge.s32.totalorder %s456_s14, 2 }
   0x6   : > { %s505_s19 = scalar_select %p19_p0, %s452_s13, %s21_s18  }
   0x7   : > { %p30_p3 = por %p29_p2, %p28_p1  ;;  %130 = sbr.rel (%p395_p4) target bundleno = 18 (0x12), region = 20 }
   0xc   : > { %133 = sbr.rel (!%p30_p3) target bundleno = 18 (0x12), region = 24  ;;  %s135_s20 = sand.u32 (%p30_p3), 1, %s452_s13  }
   0xd   : > { %s408_s21 = sshll.u32 (%p30_p3), %s456_s14, 4  ;;  %s396_s22 = sshll.u32 (%p30_p3), %s135_s20, 5 }
   0xe   : > { %s140_s25 = scalar_lea.vmem (%p30_p3), %s539_s0, %s408_s21  ;;  %s137_s26 = scalar_lea.vmem (%p30_p3), [#allocation2], %s396_s22 }
   0xf   : > { %v153_v0 = vld [vmem:[%s140_s25] sm:$0xff] (%p30_p3)  ;;  %v155_v1 = vld [vmem:[%s140_s25 + $0x8] sm:$0xff] (%p30_p3) }
  0x10   : > { %v157_v2 = vld [vmem:[%s140_s25 + $0x20] sm:$0xff] (%p30_p3)  ;;  %154 = vst [vmem:[%s137_s26] sm:$0xff] (%p30_p3), %v153_v0  ;;  %156 = vst [vmem:[%s137_s26 + $0x8] sm:$0xff] (%p30_p3), %v155_v1  ;;  %v159_v3 = vld [vmem:[%s140_s25 + $0x28] sm:$0xff] (%p30_p3) }
  0x11   : > { %158 = vst [vmem:[%s137_s26 + $0x10] sm:$0xff] %v157_v2  ;;  %160 = vst [vmem:[%s137_s26 + $0x18] sm:$0xff] %v159_v3 }
  0x12 PF: > { %p399_p5 = scmp.ge.s32.totalorder %s456_s14, 1  ;;  %p165_p6 = scmp.lt.s32.totalorder %s456_s14, 3 }
  0x14   : > { %p166_p7 = pnand %p399_p5, %p165_p6 }
  0x15   : > { %s172_s27 = sand.u32 (!%p166_p7), 1, %s448_s12   ;;  %p199_p8 = scmp.lt.s32.totalorder (!%p166_p7), %s392_s15, 1 }
  0x16   : > { %169 = sbr.rel (%p166_p7) target bundleno = 232 (0xe8), region = 47  ;;  %s400_s28 = sshll.u32 (!%p166_p7), %s172_s27, 5 }
  0x17   : > { %s174_s29 = scalar_lea.vmem (!%p166_p7), [#allocation2], %s400_s28 }
  0x1b   : > { %vm216_vm0 = vcmask 1043456   ;;  %v458_v4 = vmov 0.0   ;;  %v211_v5 = vld [vmem:[%s174_s29 + $0x18] sm:$0xf]  ;;  %v210_v6 = vld [vmem:[%s174_s29 + $0x10] sm:$0xf] }
  0x1c   : > { %287 = vmatprep.mubr.f32.mxu0 %v458_v4  ;;  %v209_v7 = vld [vmem:[%s174_s29 + $0x8] sm:$0xff]  ;;  %403 = vmatprep.subr.msk.mxu0 %vm216_vm0, %v211_v5  ;;  %v208_v8 = vld [vmem:[%s174_s29] sm:$0xff]  ;;  %vm212_vm1 = vcmask 97280   ;;  %s547_s15 = smov (!%p199_p8, %s392_s15), 1 }
  0x1d   : > { %404 = vmatpush1.msk.msra.mxu0 %vm216_vm0, %v210_v6  ;;  %v207_v9 = vld [vmem:[%s540_s1] sm:$0xff]  ;;  %s401_s5 = sshll.u32 %s547_s15, 3 }
  0x1e   : > { %253 = vmatprep.subr.mxu0 %v209_v7  ;;  %s202_s8 = scalar_lea.vmem %s541_s2, %s401_s5  ;;  %s206_s11 = scalar_lea.vmem %s542_s3, %s401_s5 }
  0x1f   : > { %254 = vmatpush1.msra.mxu0 %v208_v8 }
  0x20   : > { %405 = vmatmul.mubr.msk.f32.vlgmr.msra.gmra.mxu0 %vm212_vm1, %v207_v9 }
  0xe0   : > { %v289_v10 = vpop.f32.mrf.mxu0 }
  0xe1   : > { %v295_v12 = vmul.f32 %v289_v10, %v289_v10 }
  0xe2   : > { %v291_v11 = vpop.f32.mrf.mxu0 }
  0xe3   : > { %v297_v13 = vadd.f32 %v291_v11, %v289_v10  ;;  %v298_v14 = vmul.f32 %v291_v11, %v291_v11 }
  0xe5   : > { %v299_v15 = vadd.f32 %v298_v14, %v295_v12  ;;  %300 = vst [vmem:[%s202_s8] sm:$0xff] %v297_v13 }
  0xe7   : > { %301 = vst [vmem:[%s206_s11] sm:$0xff] %v299_v15 }
  0xe8 PF: > { %p11_p9 = scmp.ge.s32.totalorder %s496_s16, 4   ;;  %s543_s12 = smov %s452_s13 }
  0xe9   : > { %s544_s13 = smov %s505_s19  ;;  %s545_s14 = smov %s496_s16 }
  0xea   :  { %13 = sbr.rel (!%p11_p9) target bundleno = 2 (0x2), region = 98 }

// kernel: dil_conv_freq.3
= control target key start
LH: loop header
LB: loop body
LE: loop exit
PB: predicated region body
PF: predicated region fallthrough
CT: control target
= control target key end

     0   :  { %s446_s12 = smov 0   ;;  %s448_s13 = smov 0   ;;  %s504_s0 = inlined_call_operand.vmem [shape: f32[12,512], index: 0, kind: input, shape index: {}]   ;;  %s505_s1 = inlined_call_operand.vmem [shape: f32[8,12], index: 1, kind: input, shape index: {}]   ;;  %s506_s2 = inlined_call_operand.vmem [shape: f32[8,1], index: 2, kind: input, shape index: {}]   ;;  %s507_s3 = inlined_call_operand.vmem [shape: f32[8,512], index: 3, kind: output, shape index: {}]  }
   0x1   :  { %s450_s14 = smov 0  }
   0x2 LB: > { %s356_s15 = sadd.s32 4294967295, %s422_s14   ;;  %s463_s16 = sadd.s32 1, %s422_s14   ;;  %s422_s14 = sphi %s450_s14, %s510_s14   ;;  %s418_s13 = sphi %s448_s13, %s509_s13   ;;  %s414_s12 = sphi %s446_s12, %s508_s12  }
   0x3   : > { %s17_s17 = ssub.s32 %s422_s14, %s463_s16  ;;  %s20_s18 = sadd.s32 1, %s418_s13 }
   0x4   : > { %p18_p0 = scmp.eq.s32.totalorder %s17_s17, 0  ;;  %p27_p1 = scmp.ne.s32.totalorder %s418_s13, %s414_s12 }
   0x5   : > { %p28_p2 = scmp.eq.s32.totalorder %s422_s14, 0  ;;  %p359_p4 = scmp.ge.s32.totalorder %s422_s14, 2 }
   0x6   : > { %s472_s19 = scalar_select %p18_p0, %s418_s13, %s20_s18  }
   0x7   : > { %p29_p3 = por %p28_p2, %p27_p1  ;;  %127 = sbr.rel (%p359_p4) target bundleno = 18 (0x12), region = 24 }
   0xc   : > { %130 = sbr.rel (!%p29_p3) target bundleno = 18 (0x12), region = 28  ;;  %s132_s20 = sand.u32 (%p29_p3), 1, %s418_s13  }
   0xd   : > { %s372_s21 = sshll.u32 (%p29_p3), %s422_s14, 4  ;;  %s360_s22 = sshll.u32 (%p29_p3), %s132_s20, 5 }
   0xe   : > { %s137_s25 = scalar_lea.vmem (%p29_p3), %s504_s0, %s372_s21  ;;  %s134_s26 = scalar_lea.vmem (%p29_p3), [#allocation2], %s360_s22 }
   0xf   : > { %v150_v0 = vld [vmem:[%s137_s25] sm:$0xff] (%p29_p3)  ;;  %v152_v1 = vld [vmem:[%s137_s25 + $0x8] sm:$0xff] (%p29_p3) }
  0x10   : > { %v154_v2 = vld [vmem:[%s137_s25 + $0x20] sm:$0xff] (%p29_p3)  ;;  %151 = vst [vmem:[%s134_s26] sm:$0xff] (%p29_p3), %v150_v0  ;;  %153 = vst [vmem:[%s134_s26 + $0x8] sm:$0xff] (%p29_p3), %v152_v1  ;;  %v156_v3 = vld [vmem:[%s137_s25 + $0x28] sm:$0xff] (%p29_p3) }
  0x11   : > { %155 = vst [vmem:[%s134_s26 + $0x10] sm:$0xff] %v154_v2  ;;  %157 = vst [vmem:[%s134_s26 + $0x18] sm:$0xff] %v156_v3 }
  0x12 PF: > { %p363_p5 = scmp.ge.s32.totalorder %s422_s14, 1  ;;  %p162_p6 = scmp.lt.s32.totalorder %s422_s14, 3 }
  0x14   : > { %p163_p7 = pnand %p363_p5, %p162_p6 }
  0x15   : > { %s169_s27 = sand.u32 (!%p163_p7), 1, %s414_s12   ;;  %s365_s7 = sshll.u32 (!%p163_p7), %s356_s15, 1 }
  0x16   : > { %166 = sbr.rel (%p163_p7) target bundleno = 231 (0xe7), region = 51  ;;  %s364_s28 = sshll.u32 (!%p163_p7), %s169_s27, 5 }
  0x17   : > { %s171_s4 = scalar_lea.vmem (!%p163_p7), [#allocation2], %s364_s28  ;;  %p194_p8 = scmp.lt.s32.totalorder (!%p163_p7), %s365_s7, 3 }
  0x1b   : > { %vm214_vm0 = vcmask 1043456   ;;  %v424_v4 = vmov 0.0   ;;  %v425_v5 = vmov 0   ;;  %v204_v6 = vld [vmem:[%s506_s2] sm:$0xff]  ;;  %v203_v7 = vld [vmem:[%s171_s4 + $0x18] sm:$0xf] }
  0x1c   : > { %285 = vmatprep.mubr.f32.mxu0 %v424_v4  ;;  %399 = vset.pattern.permute.xlu0 %v425_v5  ;;  %v202_v8 = vld [vmem:[%s171_s4 + $0x10] sm:$0xf]  ;;  %v201_v9 = vld [vmem:[%s171_s4 + $0x8] sm:$0xff]  ;;  %v200_v10 = vld [vmem:[%s171_s4] sm:$0xff]  ;;  %vm210_vm1 = vcmask 97280   ;;  %s512_s7 = smov (!%p194_p8, %s365_s7), 3 }
  0x1d   : > { %207 = vperm.xlu0 %399, %v204_v6   ;;  %367 = vmatprep.subr.msk.mxu0 %vm214_vm0, %v203_v7  ;;  %v199_v11 = vld [vmem:[%s505_s1] sm:$0xff]  ;;  %s366_s8 = sshll.u32 %s512_s7, 3 }
  0x1e   : > { %368 = vmatpush1.msk.msra.mxu0 %vm214_vm0, %v202_v8  ;;  %s197_s11 = scalar_lea.vmem %s507_s3, %s366_s8 }
  0x1f   : > { %251 = vmatprep.subr.mxu0 %v201_v9 }
  0x20   : > { %252 = vmatpush1.msra.mxu0 %v200_v10 }
  0x21   : > { %369 = vmatmul.mubr.msk.f32.vlgmr.msra.gmra.mxu0 %vm210_vm1, %v199_v11 }
  0x98   : > { %v208_v12 = vpop.permute.xlu0 %207 }
  0xe1   : > { %v287_v13 = vpop.f32.mrf.mxu0 }
  0xe2   : > { %v288_v14 = vadd.f32 %v287_v13, %v208_v12 }
  0xe3   : > { %v289_v15 = vpop.f32.mrf.mxu0 }
  0xe4   : > { %292 = vst [vmem:[%s197_s11] sm:$0xff] %v288_v14  ;;  %v290_v16 = vadd.f32 %v289_v15, %v208_v12 }
  0xe6   : > { %293 = vst [vmem:[%s197_s11 + $0x8] sm:$0xff] %v290_v16 }
  0xe7 PF: > { %p10_p9 = scmp.ge.s32.totalorder %s463_s16, 4   ;;  %s508_s12 = smov %s418_s13 }
  0xe8   : > { %s509_s13 = smov %s472_s19  ;;  %s510_s14 = smov %s463_s16 }
  0xe9   :  { %12 = sbr.rel (!%p10_p9) target bundleno = 2 (0x2), region = 90 }

</bundles_post_ra>
